<compile_context>
chip_gen: v5e
topology: v5e:2x2
jax: 0.10.0
libtpu: 0.0.40
codegen_flags: <defaults>
</compile_context>

<pallas_src>
import functools

import jax
import jax.numpy as jnp
from jax import lax
from jax.experimental import pallas as pl
from jax.experimental.pallas import tpu as pltpu


def _admsoftmax_kernel(x_ref, w_ref, lab_ref, wf_ref, l_ref,
                       xn_sc, excl_sc, logity_sc, *, s, m, n_pad_classes, tc):
    j = pl.program_id(1)

    @pl.when(j == 0)
    def _init():
        x = x_ref[...].astype(jnp.float32)                        # (TN, D)
        sumsq = jnp.sum(x * x, axis=1, keepdims=True)
        # F.normalize: x / max(||x||, 1e-12) == x * rsqrt(max(||x||^2, 1e-24))
        xn = x * lax.rsqrt(jnp.maximum(sumsq, 1e-24))
        xn_sc[...] = xn.astype(xn_sc.dtype)
        excl_sc[...] = jnp.zeros_like(excl_sc)
        logity_sc[...] = jnp.zeros_like(logity_sc)

    # (TN, D) @ (D, TC) -> (TN, TC) on the MXU, f32 accumulation.  W is
    # already (D, C)-major so no in-kernel transpose is needed.
    wf = jnp.dot(xn_sc[...], w_ref[...], preferred_element_type=jnp.float32)
    wf_ref[...] = wf.astype(wf_ref.dtype)

    # Label mask via a tile-local iota compared to (label - j*TC): the only
    # (TN, TC)-sized VPU work per tile is the compare + two selects + exp.
    col_local = lax.broadcasted_iota(jnp.int32, wf.shape, 1)
    lab_local = lab_ref[...] - j * tc                              # (TN, 1)
    is_label = col_local == lab_local

    # TODO(synk): no log-sum-exp stabilization, to stay faithful to the
    # (unstabilized) PyTorch formulation; add a running-max rescale if
    # s * wf can exceed ~88 with unnormalized production-scale weights.
    e = jnp.where(is_label, 0.0, jnp.exp(s * wf))                  # (TN, TC)
    wf_lab = jnp.where(is_label, wf, 0.0)

    # Per-lane partial accumulation (pure VALU adds over the TC/128 lane
    # blocks); the cross-lane (XLU) reduce happens once per row tile below.
    e_part = excl_sc[...]
    y_part = logity_sc[...]
    for blk in range(tc // 128):
        lo = blk * 128
        e_part = e_part + e[:, lo:lo + 128]
        y_part = y_part + wf_lab[:, lo:lo + 128]
    excl_sc[...] = e_part
    logity_sc[...] = y_part

    @pl.when(j == pl.num_programs(1) - 1)
    def _finalize():
        # Padded (zero) weight columns each contributed exp(s*0) = 1; remove
        # them with one scalar subtraction instead of masking every tile.
        excl_total = (jnp.sum(excl_sc[...], axis=1, keepdims=True)
                      - float(n_pad_classes))
        logit_y = jnp.sum(logity_sc[...], axis=1, keepdims=True)   # (TN, 1)
        numerator = s * (logit_y - m)
        denominator = jnp.exp(numerator) + excl_total
        li = numerator - jnp.log(denominator)                      # (TN, 1)
        # Lane-dense store (128 lanes) to avoid masked partial stores.
        l_ref[...] = jnp.broadcast_to(li, l_ref.shape)


def _round_up(a, b):
    return (a + b - 1) // b * b


def _largest_dividing_tile(total, unit, max_tile):
    """Largest multiple of `unit` that divides `total` and is <= max_tile."""
    best = unit
    t = unit
    limit = min(total, max(max_tile, unit))
    while t <= limit:
        if total % t == 0:
            best = t
        t += unit
    return best


def admsoftmax_forward(x, weight, labels, *, s=30.0, m=0.4,
                       block_n=512, block_c=2048,
                       compute_dtype=jnp.bfloat16, wf_dtype=jnp.float32):
    """x: (N, D), weight: (C, D) (nn.Linear layout), labels: (N,) int.
    Returns (wf, loss) matching AdMSoftmaxLoss.forward in training mode."""
    N, D = x.shape
    C, D2 = weight.shape
    assert D == D2
    assert labels.shape == (N,)

    csize = jnp.dtype(compute_dtype).itemsize
    wfsize = jnp.dtype(wf_dtype).itemsize

    # Pad only to hardware granules (8 sublanes / 128 lanes); tiles are then
    # chosen as divisors of the padded extents -> no extra padding waste.
    N_pad = _round_up(N, 8)
    C_pad = _round_up(C, 128)

    TN = _largest_dividing_tile(N_pad, 8, block_n)
    # Keep >= 2 row tiles when possible so the "parallel" row axis can shard
    # across v7x's two TensorCores (accepting one extra W re-stream).
    if N_pad // TN == 1 and N_pad >= 16 and (N_pad // 2) % 8 == 0:
        TN = N_pad // 2
    TC = _largest_dividing_tile(C_pad, 128, block_c)

    # VMEM budget: double-buffered pipeline buffers + resident scratch.
    phys_vmem = 64 << 20                                   # v7x floor
    try:
        phys_vmem = int(getattr(pltpu.get_tpu_info(), "vmem_capacity_bytes",
                                phys_vmem))
    except Exception:
        pass

    def vmem_need(tn, tc):
        return (2 * tn * D * 4             # x tile (f32 in), double-buffered
                + 2 * D * tc * csize       # W tile, double-buffered
                + 2 * tn * 128 * 4         # labels tile (lane-padded)
                + 2 * tn * tc * wfsize     # wf output tile, double-buffered
                + 2 * tn * 128 * 4         # per-row loss output tile
                + tn * D * csize           # cached normalized x
                + 2 * tn * 128 * 4)        # excl / label-logit accumulators

    budget = int(phys_vmem * 0.75)
    while vmem_need(TN, TC) > budget and TC > 128:
        TC = _largest_dividing_tile(C_pad, 128, TC // 2)
    while vmem_need(TN, TC) > budget and TN > 8:
        TN = _largest_dividing_tile(N_pad, 8, TN // 2)
    vmem_limit = min(max(vmem_need(TN, TC) + (4 << 20), 32 << 20),
                     int(phys_vmem * 0.9))

    x_p = jnp.pad(x.astype(jnp.float32), ((0, N_pad - N), (0, 0)))
    # One-time W transpose to (D, C) in the wrapper (amortized over the whole
    # N*C*D matmul; avoids per-tile in-kernel transposes on the XLU).
    w_t = jnp.pad(weight.astype(compute_dtype).T, ((0, 0), (0, C_pad - C)))
    lab_p = jnp.pad(labels.astype(jnp.int32), (0, N_pad - N)).reshape(N_pad, 1)

    grid = (N_pad // TN, C_pad // TC)

    cost = pl.CostEstimate(
        flops=2 * N_pad * C_pad * D,
        transcendentals=N_pad * C_pad,
        bytes_accessed=(N_pad * D * 4
                        + (N_pad // TN) * D * C_pad * csize
                        + N_pad * C_pad * wfsize
                        + N_pad * 128 * 4),
    )

    wf_pad, l_pad = pl.pallas_call(
        functools.partial(_admsoftmax_kernel, s=float(s), m=float(m),
                          n_pad_classes=C_pad - C, tc=TC),
        out_shape=(
            jax.ShapeDtypeStruct((N_pad, C_pad), wf_dtype),
            jax.ShapeDtypeStruct((N_pad, 128), jnp.float32),
        ),
        grid=grid,
        in_specs=[
            pl.BlockSpec((TN, D), lambda i, j: (i, 0)),       # x row tile
            pl.BlockSpec((D, TC), lambda i, j: (0, j)),       # W.T class tile
            pl.BlockSpec((TN, 1), lambda i, j: (i, 0)),       # labels
        ],
        out_specs=(
            pl.BlockSpec((TN, TC), lambda i, j: (i, j)),      # wf logits
            pl.BlockSpec((TN, 128), lambda i, j: (i, 0)),     # per-row loss
        ),
        scratch_shapes=[
            pltpu.VMEM((TN, D), compute_dtype),               # normalized x
            pltpu.VMEM((TN, 128), jnp.float32),               # per-lane exp sums
            pltpu.VMEM((TN, 128), jnp.float32),               # per-lane label logit
        ],
        compiler_params=pltpu.CompilerParams(
            dimension_semantics=("parallel", "arbitrary"),
            vmem_limit_bytes=vmem_limit,
        ),
        cost_estimate=cost,
    )(x_p, w_t, lab_p)

    wf = wf_pad[:N, :C]
    if wf_dtype != jnp.float32:
        wf = wf.astype(jnp.float32)
    loss = -jnp.mean(l_pad[:N, 0])
    return wf, loss


def _reference(x, weight, labels, s=30.0, m=0.4):
    # Pure-JAX reference mirroring the PyTorch code (weight NOT normalized).
    xn = x / jnp.maximum(jnp.linalg.norm(x, axis=1, keepdims=True), 1e-12)
    wf = xn @ weight.T
    logit_y = wf[jnp.arange(x.shape[0]), labels]
    numerator = s * (logit_y - m)
    onehot = jax.nn.one_hot(labels, weight.shape[0], dtype=bool)
    excl_sum = jnp.sum(jnp.where(onehot, 0.0, jnp.exp(s * wf)), axis=1)
    denominator = jnp.exp(numerator) + excl_sum
    L = numerator - jnp.log(denominator)
    return wf, -jnp.mean(L)


if __name__ == "__main__":
    # Small shapes consistent with the module: N=8, in_features=32, out_features=16.
    N, D, C = 8, 32, 16
    s_param, m_param = 30.0, 0.4

    key = jax.random.PRNGKey(0)
    kx, kw, kl = jax.random.split(key, 3)

    x = jax.random.normal(kx, (N, D), dtype=jnp.float32)
    # Deterministic nn.Linear-like init: U(-1/sqrt(D), 1/sqrt(D)).
    bound = 1.0 / (D ** 0.5)
    weight = jax.random.uniform(kw, (C, D), dtype=jnp.float32,
                                minval=-bound, maxval=bound)
    labels = jax.random.randint(kl, (N,), 0, C, dtype=jnp.int32)

    wf_ref_v, loss_ref_v = _reference(x, weight, labels, s=s_param, m=m_param)

    # f32 MXU path: tight numerical check against the reference.
    wf32, loss32 = admsoftmax_forward(x, weight, labels, s=s_param, m=m_param,
                                      compute_dtype=jnp.float32)
    jax.block_until_ready((wf32, loss32))
    assert wf32.shape == (N, C)
    assert jnp.allclose(wf32, wf_ref_v, atol=1e-4, rtol=1e-4)
    assert jnp.allclose(loss32, loss_ref_v, atol=1e-4, rtol=1e-4)

    # Default bf16 MXU path (halves W HBM traffic): looser tolerance.
    wf16, loss16 = admsoftmax_forward(x, weight, labels, s=s_param, m=m_param)
    jax.block_until_ready((wf16, loss16))
    assert jnp.isfinite(loss16)
    assert jnp.allclose(wf16, wf_ref_v, atol=3e-2, rtol=3e-2)
    assert jnp.allclose(loss16, loss_ref_v, atol=0.5, rtol=0.1)

    print("KERNEL_OK")
</pallas_src>

<mosaic_0001>
module attributes {stable_mosaic.version = 11 : i64} {
  func.func @_admsoftmax_kernel(%arg0: i32, %arg1: i32, %arg2: memref<8x32xf32, #tpu.memory_space<vmem>>, %arg3: memref<32x128xf32, #tpu.memory_space<vmem>>, %arg4: memref<8x1xi32, #tpu.memory_space<vmem>>, %arg5: memref<8x128xf32, #tpu.memory_space<vmem>>, %arg6: memref<8x128xf32, #tpu.memory_space<vmem>>, %arg7: memref<8x32xf32, #tpu.memory_space<vmem>>, %arg8: memref<8x128xf32, #tpu.memory_space<vmem>>, %arg9: memref<8x128xf32, #tpu.memory_space<vmem>>) attributes {dimension_semantics = [#tpu.dimension_semantics<parallel>, #tpu.dimension_semantics<arbitrary>], iteration_bounds = array<i64: 1, 1>, scalar_prefetch = 0 : i64, scratch_operands = 3 : i64, tpu.core_type = #tpu.core_type<tc>, window_params = [{transform_indices = @transform_0, window_bounds = array<i64: 8, 32>}, {transform_indices = @transform_1, window_bounds = array<i64: 32, 128>}, {transform_indices = @transform_2, window_bounds = array<i64: 8, 1>}, {transform_indices = @transform_3, window_bounds = array<i64: 8, 128>}, {transform_indices = @transform_4, window_bounds = array<i64: 8, 128>}]} {
    %c0_i32 = arith.constant 0 : i32
    %0 = arith.cmpi eq, %arg1, %c0_i32 : i32
    %1 = arith.extui %0 : i1 to i32
    %c0_i32_0 = arith.constant 0 : i32
    %2 = arith.cmpi ne, %1, %c0_i32_0 : i32
    scf.if %2 {
      %c0_21 = arith.constant 0 : index
      %c0_22 = arith.constant 0 : index
      %30 = vector.load %arg2[%c0_21, %c0_22] : memref<8x32xf32, #tpu.memory_space<vmem>>, vector<8x32xf32>
      %31 = arith.mulf %30, %30 : vector<8x32xf32>
      %cst_23 = arith.constant dense<0.000000e+00> : vector<8xf32>
      %32 = vector.multi_reduction <add>, %31, %cst_23 [1] : vector<8x32xf32> to vector<8xf32>
      %33 = vector.shape_cast %32 : vector<8xf32> to vector<8x1xf32>
      %cst_24 = arith.constant 1.000000e-24 : f32
      %34 = vector.broadcast %cst_24 : f32 to vector<8x1xf32>
      %35 = arith.maximumf %33, %34 : vector<8x1xf32>
      %36 = math.rsqrt %35 : vector<8x1xf32>
      %37 = vector.broadcast %36 : vector<8x1xf32> to vector<8x32xf32>
      %38 = arith.mulf %30, %37 : vector<8x32xf32>
      %c0_25 = arith.constant 0 : index
      %c0_26 = arith.constant 0 : index
      %39 = vector.load %arg7[%c0_25, %c0_26] : memref<8x32xf32, #tpu.memory_space<vmem>>, vector<8x32xf32>
      tpu.vector_store %arg7[%c0_25, %c0_26], %38 {strides = array<i32>} : memref<8x32xf32, #tpu.memory_space<vmem>>, vector<8x32xf32>,
      %cst_27 = arith.constant 0.000000e+00 : f32
      %40 = vector.broadcast %cst_27 : f32 to vector<8x128xf32>
      %c0_28 = arith.constant 0 : index
      %c0_29 = arith.constant 0 : index
      %41 = vector.load %arg8[%c0_28, %c0_29] : memref<8x128xf32, #tpu.memory_space<vmem>>, vector<8x128xf32>
      tpu.vector_store %arg8[%c0_28, %c0_29], %40 {strides = array<i32>} : memref<8x128xf32, #tpu.memory_space<vmem>>, vector<8x128xf32>,
      %cst_30 = arith.constant 0.000000e+00 : f32
      %42 = vector.broadcast %cst_30 : f32 to vector<8x128xf32>
      %c0_31 = arith.constant 0 : index
      %c0_32 = arith.constant 0 : index
      %43 = vector.load %arg9[%c0_31, %c0_32] : memref<8x128xf32, #tpu.memory_space<vmem>>, vector<8x128xf32>
      tpu.vector_store %arg9[%c0_31, %c0_32], %42 {strides = array<i32>} : memref<8x128xf32, #tpu.memory_space<vmem>>, vector<8x128xf32>,
    } else {
    }
    %c0 = arith.constant 0 : index
    %c0_1 = arith.constant 0 : index
    %3 = vector.load %arg7[%c0, %c0_1] : memref<8x32xf32, #tpu.memory_space<vmem>>, vector<8x32xf32>
    %c0_2 = arith.constant 0 : index
    %c0_3 = arith.constant 0 : index
    %4 = vector.load %arg3[%c0_2, %c0_3] : memref<32x128xf32, #tpu.memory_space<vmem>>, vector<32x128xf32>
    %cst = arith.constant dense<0.000000e+00> : vector<8x128xf32>
    %5 = tpu.matmul %3, %4, %cst {dimension_numbers = #tpu.dot_dimension_numbers<[1], [0], [0], [1], [0, 0, 1, 1], [], []>} : vector<8x32xf32>, vector<32x128xf32>, vector<8x128xf32> -> vector<8x128xf32>
    %c0_4 = arith.constant 0 : index
    %c0_5 = arith.constant 0 : index
    %6 = vector.load %arg5[%c0_4, %c0_5] : memref<8x128xf32, #tpu.memory_space<vmem>>, vector<8x128xf32>
    tpu.vector_store %arg5[%c0_4, %c0_5], %5 {strides = array<i32>} : memref<8x128xf32, #tpu.memory_space<vmem>>, vector<8x128xf32>,
    %7 = tpu.iota {dimensions = array<i32: 1>} : vector<8x128xi32>
    %c0_6 = arith.constant 0 : index
    %c0_7 = arith.constant 0 : index
    %8 = vector.load %arg4[%c0_6, %c0_7] : memref<8x1xi32, #tpu.memory_space<vmem>>, vector<8x1xi32>
    %c128_i32 = arith.constant 128 : i32
    %9 = arith.muli %arg1, %c128_i32 : i32
    %10 = vector.broadcast %9 : i32 to vector<8x1xi32>
    %11 = arith.subi %8, %10 : vector<8x1xi32>
    %12 = vector.broadcast %11 : vector<8x1xi32> to vector<8x128xi32>
    %13 = arith.cmpi eq, %7, %12 : vector<8x128xi32>
    %cst_8 = arith.constant 3.000000e+01 : f32
    %14 = vector.broadcast %cst_8 : f32 to vector<8x128xf32>
    %15 = arith.mulf %14, %5 : vector<8x128xf32>
    %16 = math.exp %15 : vector<8x128xf32>
    %cst_9 = arith.constant 0.000000e+00 : f32
    %17 = vector.broadcast %cst_9 : f32 to vector<8x128xf32>
    %18 = arith.select %13, %17, %16 : vector<8x128xi1>, vector<8x128xf32>
    %cst_10 = arith.constant 0.000000e+00 : f32
    %19 = vector.broadcast %cst_10 : f32 to vector<8x128xf32>
    %20 = arith.select %13, %5, %19 : vector<8x128xi1>, vector<8x128xf32>
    %c0_11 = arith.constant 0 : index
    %c0_12 = arith.constant 0 : index
    %21 = vector.load %arg8[%c0_11, %c0_12] : memref<8x128xf32, #tpu.memory_space<vmem>>, vector<8x128xf32>
    %c0_13 = arith.constant 0 : index
    %c0_14 = arith.constant 0 : index
    %22 = vector.load %arg9[%c0_13, %c0_14] : memref<8x128xf32, #tpu.memory_space<vmem>>, vector<8x128xf32>
    %23 = arith.addf %21, %18 : vector<8x128xf32>
    %24 = arith.addf %22, %20 : vector<8x128xf32>
    %c0_15 = arith.constant 0 : index
    %c0_16 = arith.constant 0 : index
    %25 = vector.load %arg8[%c0_15, %c0_16] : memref<8x128xf32, #tpu.memory_space<vmem>>, vector<8x128xf32>
    tpu.vector_store %arg8[%c0_15, %c0_16], %23 {strides = array<i32>} : memref<8x128xf32, #tpu.memory_space<vmem>>, vector<8x128xf32>,
    %c0_17 = arith.constant 0 : index
    %c0_18 = arith.constant 0 : index
    %26 = vector.load %arg9[%c0_17, %c0_18] : memref<8x128xf32, #tpu.memory_space<vmem>>, vector<8x128xf32>
    tpu.vector_store %arg9[%c0_17, %c0_18], %24 {strides = array<i32>} : memref<8x128xf32, #tpu.memory_space<vmem>>, vector<8x128xf32>,
    %c0_i32_19 = arith.constant 0 : i32
    %27 = arith.cmpi eq, %arg1, %c0_i32_19 : i32
    %28 = arith.extui %27 : i1 to i32
    %c0_i32_20 = arith.constant 0 : i32
    %29 = arith.cmpi ne, %28, %c0_i32_20 : i32
    scf.if %29 {
      %c0_21 = arith.constant 0 : index
      %c0_22 = arith.constant 0 : index
      %30 = vector.load %arg8[%c0_21, %c0_22] : memref<8x128xf32, #tpu.memory_space<vmem>>, vector<8x128xf32>
      %cst_23 = arith.constant dense<0.000000e+00> : vector<8xf32>
      %31 = vector.multi_reduction <add>, %30, %cst_23 [1] : vector<8x128xf32> to vector<8xf32>
      %32 = vector.shape_cast %31 : vector<8xf32> to vector<8x1xf32>
      %cst_24 = arith.constant 1.120000e+02 : f32
      %33 = vector.broadcast %cst_24 : f32 to vector<8x1xf32>
      %34 = arith.subf %32, %33 : vector<8x1xf32>
      %c0_25 = arith.constant 0 : index
      %c0_26 = arith.constant 0 : index
      %35 = vector.load %arg9[%c0_25, %c0_26] : memref<8x128xf32, #tpu.memory_space<vmem>>, vector<8x128xf32>
      %cst_27 = arith.constant dense<0.000000e+00> : vector<8xf32>
      %36 = vector.multi_reduction <add>, %35, %cst_27 [1] : vector<8x128xf32> to vector<8xf32>
      %37 = vector.shape_cast %36 : vector<8xf32> to vector<8x1xf32>
      %cst_28 = arith.constant 4.000000e-01 : f32
      %38 = vector.broadcast %cst_28 : f32 to vector<8x1xf32>
      %39 = arith.subf %37, %38 : vector<8x1xf32>
      %cst_29 = arith.constant 3.000000e+01 : f32
      %40 = vector.broadcast %cst_29 : f32 to vector<8x1xf32>
      %41 = arith.mulf %40, %39 : vector<8x1xf32>
      %42 = math.exp %41 : vector<8x1xf32>
      %43 = arith.addf %42, %34 : vector<8x1xf32>
      %44 = math.log %43 : vector<8x1xf32>
      %45 = arith.subf %41, %44 : vector<8x1xf32>
      %46 = vector.shape_cast %45 : vector<8x1xf32> to vector<8x1xf32>
      %47 = vector.broadcast %46 : vector<8x1xf32> to vector<8x128xf32>
      %c0_30 = arith.constant 0 : index
      %c0_31 = arith.constant 0 : index
      %48 = vector.load %arg6[%c0_30, %c0_31] : memref<8x128xf32, #tpu.memory_space<vmem>>, vector<8x128xf32>
      tpu.vector_store %arg6[%c0_30, %c0_31], %47 {strides = array<i32>} : memref<8x128xf32, #tpu.memory_space<vmem>>, vector<8x128xf32>,
    } else {
    }
    return
  }
  func.func @transform_0(%arg0: i32, %arg1: i32) -> (i32, i32) {
    %c0_i32 = arith.constant 0 : i32
    %c0_i32_0 = arith.constant 0 : i32
    return %arg0, %c0_i32 : i32, i32
  }
  func.func @transform_1(%arg0: i32, %arg1: i32) -> (i32, i32) {
    %c0_i32 = arith.constant 0 : i32
    %c0_i32_0 = arith.constant 0 : i32
    return %c0_i32, %arg1 : i32, i32
  }
  func.func @transform_2(%arg0: i32, %arg1: i32) -> (i32, i32) {
    %c0_i32 = arith.constant 0 : i32
    %c0_i32_0 = arith.constant 0 : i32
    return %arg0, %c0_i32 : i32, i32
  }
  func.func @transform_3(%arg0: i32, %arg1: i32) -> (i32, i32) {
    %c0_i32 = arith.constant 0 : i32
    return %arg0, %arg1 : i32, i32
  }
  func.func @transform_4(%arg0: i32, %arg1: i32) -> (i32, i32) {
    %c0_i32 = arith.constant 0 : i32
    %c0_i32_0 = arith.constant 0 : i32
    return %arg0, %c0_i32 : i32, i32
  }
}

</mosaic_0001>

<bundles_post_ra>
// kernel: tpu_custom_call.1
= control target key start
LH: loop header
LB: loop body
LE: loop exit
PB: predicated region body
PF: predicated region fallthrough
CT: control target
= control target key end

     0   :  { %10 = vsyncpa [#allocation6], 0  ;;  %s307_s0 = inlined_call_operand.vmem [shape: f32[8,32], index: 0, kind: input, shape index: {}]   ;;  %s308_s1 = inlined_call_operand.hbm [shape: f32[32,128], index: 1, kind: input, shape index: {}]   ;;  %s309_s2 = inlined_call_operand.vmem [shape: s32[8,1], index: 2, kind: input, shape index: {}]   ;;  %s310_s3 = inlined_call_operand.hbm [shape: f32[8,128], index: 3, kind: output, shape index: {0}]   ;;  %s311_s4 = inlined_call_operand.hbm [shape: f32[8,128], index: 4, kind: output, shape index: {1}]  }
   0x1   :  { %11 = vsyncpa [#allocation7], 0 }
   0x2   :  { %12 = vsyncpa [#allocation10], 0  ;;  %s19_s17 = sshll.u32 %s308_s1, 4  ;;  %s258_s18 = smov [#allocation5]   ;;  %s20_s17 = int_to_ptr.hbm [resolvable:$true] %s19_s17 }
   0x3   :  { %s21_s19 = sshll.u32 %s258_s18, 4  ;;  %s259_s20 = smov 128   ;;  %s22_s19 = int_to_ptr.vmem [resolvable:$true] %s21_s19 }
   0x4   :  { %s260_s21 = smov 8  }
   0x5   :  { %27 = dma.hbm_to_vmem [thread:$0]  %s20_s17, 512, %s22_s19, [#allocation6], %s259_s20, %s259_s20, %s260_s21  }
   0x6   :  { %252 = dma.done.wait [#allocation6], 512  }
   0x7   :  { %253 = vsyncadd [#allocation6], 4294966784  ;;  %v38_v0 = vld [vmem:[%s307_s0] sm:$0xff]  ;;  %vm40_vm0 = vcmask 261120   ;;  %v62_v4 = vld [vmem:[#allocation5 + $0x10] sm:$0xff]  ;;  %v261_v9 = vmov 0   ;;  %v89_v20 = vlaneseq }
   0x8   :  { %v39_v1 = vmul.f32 %v38_v0, %v38_v0  ;;  %v63_v3 = vld [vmem:[#allocation5 + $0x18] sm:$0xff]  ;;  %v61_v5 = vld [vmem:[#allocation5 + $0x8] sm:$0xff]  ;;  %v60_v6 = vld [vmem:[#allocation5] sm:$0xff]  ;;  %171 = vset.pattern.permute.xlu0 %v261_v9  ;;  %s136_s25 = sshll.u32 %s310_s3, 4  ;;  %s262_s26 = smov [#allocation8]   ;;  %s137_s25 = int_to_ptr.hbm [resolvable:$true] %s136_s25 }
   0x9   :  { %80 = vmatpush.msra.mxu0 %v63_v3  ;;  %v91_v7 = vld [vmem:[%s309_s2] sm:$0xff]  ;;  %v90_v21 = vand.u32 127, %v89_v20  ;;  %s134_s27 = sshll.u32 %s262_s26, 4  ;;  %s263_s28 = smov [#allocation9]   ;;  %s135_s27 = int_to_ptr.vmem [resolvable:$true] %s134_s27 }
   0xa   :  { %v41_v2 = vsel %vm40_vm0, %v39_v1, 0.0  ;;  %s145_s29 = sshll.u32 %s263_s28, 4  ;;  %s147_s5 = sshll.u32 %s311_s4, 4  ;;  %s146_s29 = int_to_ptr.vmem [resolvable:$true] %s145_s29  ;;  %s148_s5 = int_to_ptr.hbm [resolvable:$true] %s147_s5 }
   0xb   :  { %42 = vadd.xlane.f32.xlu0 %v41_v2  ;;  %81 = vmatpush.msra.mxu0 %v62_v4 }
   0xd   :  { %82 = vmatpush.msra.mxu0 %v61_v5 }
   0xf   :  { %83 = vmatpush.msra.mxu0 %v60_v6 }
  0x1f   :  { %96 = vperm.xlu0 %171, %v91_v7  }
  0x7e   :  { %v43_v8 = vpop.xlane.xlu0 %42 }
  0x7f   :  { %v44_v10 = vmax.f32 %v43_v8, 1e-24 }
  0x81   :  { %172 = vrsqrt.f32 %v44_v10  ;;  %vm51_vm2 = vweird.f32 %v44_v10 }
  0x87   :  { %v173_v11 = vpop.eup %172 }
  0x88   :  { %v46_v12 = vmul.f32 %v173_v11, %v44_v10  ;;  %vm52_vm1 = vweird.f32 %v173_v11 }
  0x89   :  { %vm53_vm3 = vmor %vm51_vm2, %vm52_vm1 }
  0x8a   :  { %v47_v13 = vmul.f32 %v173_v11, %v46_v12 }
  0x8c   :  { %v48_v14 = vmul.f32 0.5, %v47_v13 }
  0x8e   :  { %v49_v15 = vsub.f32 1.5, %v48_v14 }
  0x90   :  { %v50_v16 = vmul.f32 %v173_v11, %v49_v15 }
  0x91   :  { %v97_v22 = vpop.permute.xlu0 %96 }
  0x92   :  { %v54_v17 = vsel %vm53_vm3, %v173_v11, %v50_v16  ;;  %vm98_vm4 = vcmp.eq.s32.totalorder %v90_v21, %v97_v22 }
  0x93   :  { %v55_v18 = vmul.f32 %v54_v17, %v38_v0 }
  0x95   :  { %56 = vst.msk [vmem:[#allocation2] sm:$0xff] %vm40_vm0, %v55_v18 }
  0x9c   :  { %v59_v19 = vld [vmem:[#allocation2] sm:$0xff] }
  0x9d   :  { %162 = vmatmul.msk.f32.vlgmr.msra.gmra.mxu0 %vm40_vm0, %v59_v19 }
 0x11a   :  { %v85_v23 = vpop.f32.mrf.mxu0 }
 0x11b   :  { %88 = vst [vmem:[#allocation8] sm:$0xff] %v85_v23  ;;  %v99_v24 = vmul.f32 30.0, %v85_v23  ;;  %v103_v25 = vsel %vm98_vm4, %v85_v23, 0.0 }
 0x11c   :  { %118 = vadd.xlane.f32.xlu1 %v103_v25  ;;  %139 = dma.vmem_to_hbm [thread:$0]  %s135_s27, 128, %s137_s25, [#allocation7]  }
 0x11d   :  { %v100_v26 = vmul.f32 1.442695, %v99_v24 }
 0x11f   :  { %174 = vpow2.f32 %v100_v26 }
 0x125   :  { %v175_v27 = vpop.eup %174 }
 0x126   :  { %v102_v28 = vsel %vm98_vm4, 0.0, %v175_v27 }
 0x127   :  { %114 = vadd.xlane.f32.xlu1 %v102_v28 }
 0x18f   :  { %v119_v29 = vpop.xlane.xlu1 %118 }
 0x190   :  { %v164_v30 = vadd.f32 -0.4, %v119_v29 }
 0x192   :  { %v121_v31 = vmul.f32 30.0, %v164_v30 }
 0x194   :  { %v122_v32 = vmul.f32 1.442695, %v121_v31 }
 0x196   :  { %176 = vpow2.f32 %v122_v32 }
 0x19a   :  { %v115_v33 = vpop.xlane.xlu1 %114 }
 0x19b   :  { %v163_v34 = vadd.f32 -112.0, %v115_v33 }
 0x19c   :  { %v177_v35 = vpop.eup %176 }
 0x19d   :  { %v124_v36 = vadd.f32 %v177_v35, %v163_v34 }
 0x19f   :  { %178 = vlog2.f32 %v124_v36 }
 0x1a5   :  { %v179_v37 = vpop.eup %178 }
 0x1a6   :  { %v126_v38 = vmul.f32 0.6931472, %v179_v37 }
 0x1a8   :  { %v127_v39 = vsub.f32 %v121_v31, %v126_v38 }
 0x1aa   :  { %128 = vst [vmem:[#allocation9] sm:$0xff] %v127_v39 }
 0x1ab   :  { %150 = dma.vmem_to_hbm [thread:$0]  %s146_s29, 128, %s148_s5, [#allocation10]  }
 0x1ac   :  { %254 = dma.done.wait [#allocation7], 128  }
 0x1ad   :  { %255 = vsyncadd [#allocation7], 4294967168 }
 0x1ae   :  { %256 = dma.done.wait [#allocation10], 128  }
 0x1af   :  { %257 = vsyncadd [#allocation10], 4294967168 }
 0x1b0   :  { %159 = vsyncpa [#allocation6], 1 }
 0x1b1   :  { %160 = vsyncpa [#allocation7], 1 }
 0x1b2   :  { %161 = vsyncpa [#allocation10], 1 }

</bundles_post_ra>
